<compile_context>
chip_gen: v6e
topology: v6e:2x2x1
jax: 0.10.0
libtpu: 0.0.40
codegen_flags: <defaults>
</compile_context>

<pallas_src>
import math
import numpy as np
import jax
import jax.numpy as jnp
from jax import lax
from jax.experimental import pallas as pl
from jax.experimental.pallas import tpu as pltpu


# ----------------------------------------------------------------------------
# Kernel 1: fused QKV projection + rotary
#   grid = (B, nq, H); H innermost -> x tile resident across heads.
# ----------------------------------------------------------------------------
def _make_qkv_rotary_kernel(HD, HD2, scale):
    def kernel(x_ref, w_ref, cos_ref, sin_ref, q_ref, k_ref, v_ref):
        x = x_ref[0]                 # (tq, C)     bf16
        w = w_ref[0]                 # (C, 3*HD)   bf16 (q|k|v fused, q/k rotary-permuted)
        cos = cos_ref[...]           # (tq, HD2)   f32
        sin = sin_ref[...]           # (tq, HD2)   f32

        qkv = jnp.dot(x, w, preferred_element_type=jnp.float32)   # (tq, 3*HD)
        q = qkv[:, 0 * HD:1 * HD]
        k = qkv[:, 1 * HD:2 * HD]
        v = qkv[:, 2 * HD:3 * HD]

        def rot(t):
            # Weight columns permuted host-side: first half = even lanes (x1),
            # second half = odd lanes (x2) -> matches torch apply_rotary exactly.
            t1 = t[:, :HD2]
            t2 = t[:, HD2:]
            return jnp.concatenate([t1 * cos - t2 * sin,
                                    t1 * sin + t2 * cos], axis=-1)

        # softmax scale and log2(e) folded into q here -> exp2 in kernel 2.
        q_ref[0, 0] = (rot(q) * scale).astype(q_ref.dtype)
        k_ref[0, 0] = rot(k).astype(k_ref.dtype)
        v_ref[0, 0] = v.astype(v_ref.dtype)

    return kernel


# ----------------------------------------------------------------------------
# Kernel 2: flash attention (online softmax, base-2) + fused per-head out-projection
#   grid = (B, nq, H, nkv); (H, nkv) are reduction ("arbitrary") axes.
# ----------------------------------------------------------------------------
def _make_flash_kernel(tq, tkv):
    NEG_BIG = -1e30   # plain Python float: no captured traced constant, no -inf NaNs

    def kernel(q_ref, k_ref, v_ref, wout_ref, o_ref, m_sc, l_sc, acc_sc, y_sc):
        i = pl.program_id(1)        # q tile
        h = pl.program_id(2)        # head
        j = pl.program_id(3)        # kv tile
        nh = pl.num_programs(2)
        nkv = pl.num_programs(3)

        @pl.when(jnp.logical_and(h == 0, j == 0))
        def _():                    # new (batch, q-tile): reset fused-out accumulator
            y_sc[...] = jnp.zeros_like(y_sc)

        @pl.when(j == 0)
        def _():                    # new head: reset online-softmax state
            m_sc[...] = jnp.full_like(m_sc, NEG_BIG)
            l_sc[...] = jnp.zeros_like(l_sc)
            acc_sc[...] = jnp.zeros_like(acc_sc)

        # Tile classification from scalar grid indices (no per-element work):
        live = j * tkv < (i + 1) * tq             # tile has >=1 unmasked element
        diag = (j + 1) * tkv - 1 > i * tq         # tile touches the masked region

        def make_body(apply_mask):
            def body():
                q = q_ref[0, 0]     # (tq, HD)  bf16 (pre-scaled by log2e/sqrt(HD))
                k = k_ref[0, 0]     # (tkv, HD) bf16
                v = v_ref[0, 0]     # (tkv, HD) bf16

                # contract last dims directly (no explicit K transpose)
                s = lax.dot_general(q, k, (((1,), (1,)), ((), ())),
                                    preferred_element_type=jnp.float32)   # (tq, tkv)

                if apply_mask:      # only diagonal tiles pay for iota/compare/select
                    row = i * tq + lax.broadcasted_iota(jnp.int32, (tq, tkv), 0)
                    col = j * tkv + lax.broadcasted_iota(jnp.int32, (tq, tkv), 1)
                    s = jnp.where(col > row, NEG_BIG, s)

                m_prev = m_sc[...]
                m_new = jnp.maximum(m_prev, jnp.max(s, axis=-1, keepdims=True))
                alpha = jnp.exp2(m_prev - m_new)          # base-2: log2e folded into q
                p = jnp.exp2(s - m_new)
                l_sc[...] = alpha * l_sc[...] + jnp.sum(p, axis=-1, keepdims=True)
                acc_sc[...] = alpha * acc_sc[...] + jnp.dot(
                    p.astype(v.dtype), v, preferred_element_type=jnp.float32)
                m_sc[...] = m_new
            return body

        pl.when(jnp.logical_and(live, diag))(make_body(True))
        pl.when(jnp.logical_and(live, jnp.logical_not(diag)))(make_body(False))

        # Per-head finalize: normalize and fuse the per-head slice of out_proj:
        #   concat(heads) @ W_out == sum_h head_h @ W_out[h*HD:(h+1)*HD, :]
        @pl.when(j == nkv - 1)
        def _():
            inv_l = 1.0 / l_sc[...]     # exact: runs once per head/q-tile, off hot loop
            head = (acc_sc[...] * inv_l).astype(jnp.bfloat16)              # (tq, HD)
            y_sc[...] += jnp.dot(head, wout_ref[h],
                                 preferred_element_type=jnp.float32)       # (tq, C)

        @pl.when(jnp.logical_and(h == nh - 1, j == nkv - 1))
        def _():
            o_ref[0] = y_sc[...].astype(o_ref.dtype)

    return kernel


# ----------------------------------------------------------------------------
# Wrapper
# ----------------------------------------------------------------------------
def attention_pallas(x, freqs, w_qkv, w_out, n_heads, *, q_tile=128, kv_tile=128):
    B, T, C = x.shape
    H = n_heads
    HD = C // H
    HD2 = HD // 2
    assert C % H == 0 and HD % 2 == 0
    tq = min(q_tile, T)
    tkv = min(kv_tile, T)
    assert T % tq == 0 and T % tkv == 0
    nq, nkv = T // tq, T // tkv
    # softmax scale * log2(e): kernel 2 uses exp2 instead of exp.
    scale = math.log2(math.e) / math.sqrt(HD)

    # --- host-side weight prep ------------------------------------------------
    # Fold the rotary even/odd de-interleave into the q/k weight columns: within each
    # head, output dims are reordered [0,2,4,...,1,3,5,...].  The rotated q/k then come
    # out exactly in torch's apply_rotary layout; v and W_out keep the original order.
    perm = np.concatenate([np.arange(0, HD, 2), np.arange(1, HD, 2)])
    w_qkv_np = np.asarray(w_qkv, np.float32)        # (3C, C)  torch (out, in)
    w_out_np = np.asarray(w_out, np.float32)        # (C, C)

    wq = w_qkv_np[0 * C:1 * C].reshape(H, HD, C)[:, perm, :]   # (H, HD, C)
    wk = w_qkv_np[1 * C:2 * C].reshape(H, HD, C)[:, perm, :]   # (H, HD, C)
    wv = w_qkv_np[2 * C:3 * C].reshape(H, HD, C)               # (H, HD, C)
    # Fused per-head weight: (H, C, 3*HD), columns ordered [q | k | v].
    w_fused = np.concatenate([wq, wk, wv], axis=1).transpose(0, 2, 1)
    wo = w_out_np.T.reshape(H, HD, C)                          # (H, HD, C)

    w_fused = jnp.asarray(w_fused, jnp.bfloat16)
    wo = jnp.asarray(wo, jnp.bfloat16)
    x_bf = jnp.asarray(x, jnp.bfloat16)

    freqs_f = jnp.asarray(freqs, jnp.float32)       # (T, HD2)
    cosf = jnp.cos(freqs_f)                         # precomputed once
    sinf = jnp.sin(freqs_f)

    # --- kernel 1: fused QKV projection + rotary -------------------------------
    qkv_shape = jax.ShapeDtypeStruct((B, H, T, HD), jnp.bfloat16)
    q_rot, k_rot, v_heads = pl.pallas_call(
        _make_qkv_rotary_kernel(HD, HD2, scale),
        out_shape=(qkv_shape, qkv_shape, qkv_shape),
        grid_spec=pltpu.PrefetchScalarGridSpec(
            num_scalar_prefetch=0,
            grid=(B, nq, H),                 # H innermost: x resident across heads
            in_specs=[
                pl.BlockSpec((1, tq, C), lambda b, i, h: (b, i, 0)),       # x
                pl.BlockSpec((1, C, 3 * HD), lambda b, i, h: (h, 0, 0)),   # fused W
                pl.BlockSpec((tq, HD2), lambda b, i, h: (i, 0)),           # cos
                pl.BlockSpec((tq, HD2), lambda b, i, h: (i, 0)),           # sin
            ],
            out_specs=[
                pl.BlockSpec((1, 1, tq, HD), lambda b, i, h: (b, h, i, 0)),
                pl.BlockSpec((1, 1, tq, HD), lambda b, i, h: (b, h, i, 0)),
                pl.BlockSpec((1, 1, tq, HD), lambda b, i, h: (b, h, i, 0)),
            ],
        ),
        compiler_params=pltpu.CompilerParams(
            # H "arbitrary" so megacore splits on B/nq and per-core x residency holds.
            dimension_semantics=("parallel", "parallel", "arbitrary")),
        cost_estimate=pl.CostEstimate(
            flops=int(6 * B * T * C * C),
            transcendentals=0,
            bytes_accessed=int(2 * (B * T * C + B * nq * 3 * C * C + 3 * B * T * C))),
    )(x_bf, w_fused, cosf, sinf)

    # --- kernel 2: flash attention + fused out-projection ----------------------
    def kv_map(b, i, h, j):
        # Clamp causally-dead kv tiles to the last live tile -> no DMA for them.
        j_max = ((i + 1) * tq - 1) // tkv
        return (b, h, jnp.minimum(j, j_max), 0)

    out = pl.pallas_call(
        _make_flash_kernel(tq, tkv),
        out_shape=jax.ShapeDtypeStruct((B, T, C), jnp.bfloat16),
        grid_spec=pltpu.PrefetchScalarGridSpec(
            num_scalar_prefetch=0,
            grid=(B, nq, H, nkv),
            in_specs=[
                pl.BlockSpec((1, 1, tq, HD), lambda b, i, h, j: (b, h, i, 0)),   # q
                pl.BlockSpec((1, 1, tkv, HD), kv_map),                           # k
                pl.BlockSpec((1, 1, tkv, HD), kv_map),                           # v
                pl.BlockSpec((H, HD, C), lambda b, i, h, j: (0, 0, 0)),          # W_out (resident)
            ],
            out_specs=pl.BlockSpec((1, tq, C), lambda b, i, h, j: (b, i, 0)),
            scratch_shapes=[
                pltpu.VMEM((tq, 1), jnp.float32),    # m  (running max, log2 domain)
                pltpu.VMEM((tq, 1), jnp.float32),    # l  (running denom)
                pltpu.VMEM((tq, HD), jnp.float32),   # acc (unnormalized head out)
                pltpu.VMEM((tq, C), jnp.float32),    # y  (fused out-proj accumulator)
            ],
        ),
        compiler_params=pltpu.CompilerParams(
            dimension_semantics=("parallel", "parallel", "arbitrary", "arbitrary"),
            vmem_limit_bytes=64 * 1024 * 1024),
        cost_estimate=pl.CostEstimate(
            flops=int(2 * B * H * T * T * HD + 2 * B * T * C * C),   # ~causal
            transcendentals=int(B * H * T * T // 2),
            bytes_accessed=int(2 * (3 * B * H * T * HD + H * HD * C) + 2 * B * T * C)),
    )(q_rot, k_rot, v_heads, wo)
    return out


# ----------------------------------------------------------------------------
# Pure-JAX reference (mirrors the PyTorch forward, all f32)
# ----------------------------------------------------------------------------
def attention_ref(x, freqs, w_qkv, w_out, n_heads):
    B, T, C = x.shape
    H = n_heads
    HD = C // H
    qkv = x @ w_qkv.T
    qkv = qkv.reshape(B, T, 3, H, HD).transpose(0, 3, 2, 1, 4)   # (B,H,3,T,HD)
    q, k, v = qkv[:, :, 0], qkv[:, :, 1], qkv[:, :, 2]

    def rot(t):
        t1, t2 = t[..., ::2], t[..., 1::2]
        s, c = jnp.sin(freqs), jnp.cos(freqs)
        return jnp.concatenate([t1 * c - t2 * s, t1 * s + t2 * c], axis=-1)

    q, k = rot(q), rot(k)
    attn = q @ jnp.swapaxes(k, -2, -1) / math.sqrt(HD)
    mask = jnp.triu(jnp.ones((T, T)), 1) == 1
    attn = jnp.where(mask, -jnp.inf, attn)
    attn = jax.nn.softmax(attn, axis=-1)
    out = (attn @ v).transpose(0, 2, 1, 3).reshape(B, T, C)
    return out @ w_out.T


if __name__ == "__main__":
    B, T, dim, n_heads = 2, 8, 32, 2
    HD = dim // n_heads

    key = jax.random.PRNGKey(0)
    kx, kqkv, kout = jax.random.split(key, 3)
    x = jax.random.normal(kx, (B, T, dim), jnp.float32)
    # Parameters in nn.Linear layout (out, in), bias=False.
    w_qkv = 0.02 * jax.random.normal(kqkv, (3 * dim, dim), jnp.float32)
    w_out = 0.02 * jax.random.normal(kout, (dim, dim), jnp.float32)
    # Rotary frequencies: (T, head_dim // 2)
    inv_freq = 1.0 / (10000.0 ** (jnp.arange(0, HD, 2, dtype=jnp.float32) / HD))
    freqs = jnp.arange(T, dtype=jnp.float32)[:, None] * inv_freq[None, :]

    out = attention_pallas(x, freqs, w_qkv, w_out, n_heads)
    out = jax.block_until_ready(out)

    ref = attention_ref(x, freqs, w_qkv, w_out, n_heads)
    # bf16 weights/activations/output -> loosened tolerances vs f32 ref.
    np.testing.assert_allclose(np.asarray(out.astype(jnp.float32)),
                               np.asarray(ref), rtol=2e-2, atol=2e-3)
    print("KERNEL_OK")
</pallas_src>

<mosaic_0001>
module attributes {stable_mosaic.version = 11 : i64} {
  func.func @kernel(%arg0: i32, %arg1: i32, %arg2: i32, %arg3: memref<1x8x32xbf16, #tpu.memory_space<vmem>>, %arg4: memref<1x32x48xbf16, #tpu.memory_space<vmem>>, %arg5: memref<8x8xf32, #tpu.memory_space<vmem>>, %arg6: memref<8x8xf32, #tpu.memory_space<vmem>>, %arg7: memref<1x1x8x16xbf16, #tpu.memory_space<vmem>>, %arg8: memref<1x1x8x16xbf16, #tpu.memory_space<vmem>>, %arg9: memref<1x1x8x16xbf16, #tpu.memory_space<vmem>>) attributes {dimension_semantics = [#tpu.dimension_semantics<parallel>, #tpu.dimension_semantics<parallel>, #tpu.dimension_semantics<arbitrary>], iteration_bounds = array<i64: 2, 1, 2>, scalar_prefetch = 0 : i64, scratch_operands = 0 : i64, tpu.core_type = #tpu.core_type<tc>, window_params = [{transform_indices = @transform_0, window_bounds = array<i64: 1, 8, 32>}, {transform_indices = @transform_1, window_bounds = array<i64: 1, 32, 48>}, {transform_indices = @transform_2, window_bounds = array<i64: 8, 8>}, {transform_indices = @transform_3, window_bounds = array<i64: 8, 8>}, {transform_indices = @transform_4, window_bounds = array<i64: 1, 1, 8, 16>}, {transform_indices = @transform_5, window_bounds = array<i64: 1, 1, 8, 16>}, {transform_indices = @transform_6, window_bounds = array<i64: 1, 1, 8, 16>}]} {
    %c0 = arith.constant 0 : index
    %c0_0 = arith.constant 0 : index
    %c0_1 = arith.constant 0 : index
    %0 = vector.load %arg3[%c0, %c0_0, %c0_1] : memref<1x8x32xbf16, #tpu.memory_space<vmem>>, vector<1x8x32xbf16>
    %1 = vector.shape_cast %0 : vector<1x8x32xbf16> to vector<8x32xbf16>
    %c0_2 = arith.constant 0 : index
    %c0_3 = arith.constant 0 : index
    %c0_4 = arith.constant 0 : index
    %2 = vector.load %arg4[%c0_2, %c0_3, %c0_4] : memref<1x32x48xbf16, #tpu.memory_space<vmem>>, vector<1x32x48xbf16>
    %3 = vector.shape_cast %2 : vector<1x32x48xbf16> to vector<32x48xbf16>
    %c0_5 = arith.constant 0 : index
    %c0_6 = arith.constant 0 : index
    %4 = vector.load %arg5[%c0_5, %c0_6] : memref<8x8xf32, #tpu.memory_space<vmem>>, vector<8x8xf32>
    %c0_7 = arith.constant 0 : index
    %c0_8 = arith.constant 0 : index
    %5 = vector.load %arg6[%c0_7, %c0_8] : memref<8x8xf32, #tpu.memory_space<vmem>>, vector<8x8xf32>
    %cst = arith.constant dense<0.000000e+00> : vector<8x48xf32>
    %6 = tpu.matmul %1, %3, %cst {dimension_numbers = #tpu.dot_dimension_numbers<[1], [0], [0], [1], [0, 0, 1, 1], [], []>} : vector<8x32xbf16>, vector<32x48xbf16>, vector<8x48xf32> -> vector<8x48xf32>
    %7 = vector.extract_strided_slice %6 {offsets = [0, 0], sizes = [8, 16], strides = [1, 1]} : vector<8x48xf32> to vector<8x16xf32>
    %8 = vector.extract_strided_slice %6 {offsets = [0, 16], sizes = [8, 16], strides = [1, 1]} : vector<8x48xf32> to vector<8x16xf32>
    %9 = vector.extract_strided_slice %6 {offsets = [0, 32], sizes = [8, 16], strides = [1, 1]} : vector<8x48xf32> to vector<8x16xf32>
    %10 = vector.extract_strided_slice %7 {offsets = [0, 0], sizes = [8, 8], strides = [1, 1]} : vector<8x16xf32> to vector<8x8xf32>
    %11 = vector.extract_strided_slice %7 {offsets = [0, 8], sizes = [8, 8], strides = [1, 1]} : vector<8x16xf32> to vector<8x8xf32>
    %12 = arith.mulf %10, %4 : vector<8x8xf32>
    %13 = arith.mulf %11, %5 : vector<8x8xf32>
    %14 = arith.subf %12, %13 : vector<8x8xf32>
    %15 = arith.mulf %10, %5 : vector<8x8xf32>
    %16 = arith.mulf %11, %4 : vector<8x8xf32>
    %17 = arith.addf %15, %16 : vector<8x8xf32>
    %18 = tpu.concatenate %14, %17 in 1 : vector<8x8xf32>, vector<8x8xf32> -> vector<8x16xf32>
    %cst_9 = arith.constant 0.360673755 : f32
    %19 = vector.broadcast %cst_9 : f32 to vector<8x16xf32>
    %20 = arith.mulf %18, %19 : vector<8x16xf32>
    %21 = arith.truncf %20 : vector<8x16xf32> to vector<8x16xbf16>
    %c0_10 = arith.constant 0 : index
    %c0_11 = arith.constant 0 : index
    %c0_12 = arith.constant 0 : index
    %c0_13 = arith.constant 0 : index
    %22 = vector.load %arg7[%c0_10, %c0_11, %c0_12, %c0_13] : memref<1x1x8x16xbf16, #tpu.memory_space<vmem>>, vector<1x1x8x16xbf16>
    %23 = vector.shape_cast %22 : vector<1x1x8x16xbf16> to vector<8x16xbf16>
    %24 = vector.shape_cast %21 : vector<8x16xbf16> to vector<1x1x8x16xbf16>
    tpu.vector_store %arg7[%c0_10, %c0_11, %c0_12, %c0_13], %24 {strides = array<i32>} : memref<1x1x8x16xbf16, #tpu.memory_space<vmem>>, vector<1x1x8x16xbf16>,
    %25 = vector.extract_strided_slice %8 {offsets = [0, 0], sizes = [8, 8], strides = [1, 1]} : vector<8x16xf32> to vector<8x8xf32>
    %26 = vector.extract_strided_slice %8 {offsets = [0, 8], sizes = [8, 8], strides = [1, 1]} : vector<8x16xf32> to vector<8x8xf32>
    %27 = arith.mulf %25, %4 : vector<8x8xf32>
    %28 = arith.mulf %26, %5 : vector<8x8xf32>
    %29 = arith.subf %27, %28 : vector<8x8xf32>
    %30 = arith.mulf %25, %5 : vector<8x8xf32>
    %31 = arith.mulf %26, %4 : vector<8x8xf32>
    %32 = arith.addf %30, %31 : vector<8x8xf32>
    %33 = tpu.concatenate %29, %32 in 1 : vector<8x8xf32>, vector<8x8xf32> -> vector<8x16xf32>
    %34 = arith.truncf %33 : vector<8x16xf32> to vector<8x16xbf16>
    %c0_14 = arith.constant 0 : index
    %c0_15 = arith.constant 0 : index
    %c0_16 = arith.constant 0 : index
    %c0_17 = arith.constant 0 : index
    %35 = vector.load %arg8[%c0_14, %c0_15, %c0_16, %c0_17] : memref<1x1x8x16xbf16, #tpu.memory_space<vmem>>, vector<1x1x8x16xbf16>
    %36 = vector.shape_cast %35 : vector<1x1x8x16xbf16> to vector<8x16xbf16>
    %37 = vector.shape_cast %34 : vector<8x16xbf16> to vector<1x1x8x16xbf16>
    tpu.vector_store %arg8[%c0_14, %c0_15, %c0_16, %c0_17], %37 {strides = array<i32>} : memref<1x1x8x16xbf16, #tpu.memory_space<vmem>>, vector<1x1x8x16xbf16>,
    %38 = arith.truncf %9 : vector<8x16xf32> to vector<8x16xbf16>
    %c0_18 = arith.constant 0 : index
    %c0_19 = arith.constant 0 : index
    %c0_20 = arith.constant 0 : index
    %c0_21 = arith.constant 0 : index
    %39 = vector.load %arg9[%c0_18, %c0_19, %c0_20, %c0_21] : memref<1x1x8x16xbf16, #tpu.memory_space<vmem>>, vector<1x1x8x16xbf16>
    %40 = vector.shape_cast %39 : vector<1x1x8x16xbf16> to vector<8x16xbf16>
    %41 = vector.shape_cast %38 : vector<8x16xbf16> to vector<1x1x8x16xbf16>
    tpu.vector_store %arg9[%c0_18, %c0_19, %c0_20, %c0_21], %41 {strides = array<i32>} : memref<1x1x8x16xbf16, #tpu.memory_space<vmem>>, vector<1x1x8x16xbf16>,
    return
  }
  func.func @transform_0(%arg0: i32, %arg1: i32, %arg2: i32) -> (i32, i32, i32) {
    %c0_i32 = arith.constant 0 : i32
    %c0_i32_0 = arith.constant 0 : i32
    return %arg0, %arg1, %c0_i32 : i32, i32, i32
  }
  func.func @transform_1(%arg0: i32, %arg1: i32, %arg2: i32) -> (i32, i32, i32) {
    %c0_i32 = arith.constant 0 : i32
    %c0_i32_0 = arith.constant 0 : i32
    %c0_i32_1 = arith.constant 0 : i32
    return %arg2, %c0_i32, %c0_i32_0 : i32, i32, i32
  }
  func.func @transform_2(%arg0: i32, %arg1: i32, %arg2: i32) -> (i32, i32) {
    %c0_i32 = arith.constant 0 : i32
    %c0_i32_0 = arith.constant 0 : i32
    return %arg1, %c0_i32 : i32, i32
  }
  func.func @transform_3(%arg0: i32, %arg1: i32, %arg2: i32) -> (i32, i32) {
    %c0_i32 = arith.constant 0 : i32
    %c0_i32_0 = arith.constant 0 : i32
    return %arg1, %c0_i32 : i32, i32
  }
  func.func @transform_4(%arg0: i32, %arg1: i32, %arg2: i32) -> (i32, i32, i32, i32) {
    %c0_i32 = arith.constant 0 : i32
    %c0_i32_0 = arith.constant 0 : i32
    return %arg0, %arg2, %arg1, %c0_i32 : i32, i32, i32, i32
  }
  func.func @transform_5(%arg0: i32, %arg1: i32, %arg2: i32) -> (i32, i32, i32, i32) {
    %c0_i32 = arith.constant 0 : i32
    %c0_i32_0 = arith.constant 0 : i32
    return %arg0, %arg2, %arg1, %c0_i32 : i32, i32, i32, i32
  }
  func.func @transform_6(%arg0: i32, %arg1: i32, %arg2: i32) -> (i32, i32, i32, i32) {
    %c0_i32 = arith.constant 0 : i32
    %c0_i32_0 = arith.constant 0 : i32
    return %arg0, %arg2, %arg1, %c0_i32 : i32, i32, i32, i32
  }
}

</mosaic_0001>

<bundles_post_ra>
// kernel: tpu_custom_call.1
= control target key start
LH: loop header
LB: loop body
LE: loop exit
PB: predicated region body
PF: predicated region fallthrough
CT: control target
= control target key end

     0   :  { %s1792_s0 = inlined_call_operand.hbm [shape: bf16[2,8,32], index: 0, kind: input, shape index: {}]   ;;  %s1793_s1 = inlined_call_operand.hbm [shape: bf16[2,32,48], index: 1, kind: input, shape index: {}]   ;;  %s1794_s2 = inlined_call_operand.hbm [shape: f32[8,8], index: 2, kind: input, shape index: {}]   ;;  %s1795_s3 = inlined_call_operand.hbm [shape: f32[8,8], index: 3, kind: input, shape index: {}]   ;;  %s1796_s4 = inlined_call_operand.hbm [shape: bf16[2,2,8,16], index: 4, kind: output, shape index: {0}]   ;;  %s1797_s5 = inlined_call_operand.hbm [shape: bf16[2,2,8,16], index: 5, kind: output, shape index: {1}]   ;;  %s1798_s6 = inlined_call_operand.hbm [shape: bf16[2,2,8,16], index: 6, kind: output, shape index: {2}]  }
   0x1   :  { %1817 = sst [smem:[#allocation30_spill]] %s1792_s0 }
   0x2   :  { %1818 = sst [smem:[#allocation31_spill]] %s1794_s2 }
   0x3   :  { %1819 = sst [smem:[#allocation32_spill]] %s1795_s3 }
   0x4   :  { %1820 = sst [smem:[#allocation33_spill]] %s1796_s4 }
   0x5   :  { %1821 = sst [smem:[#allocation34_spill]] %s1797_s5 }
   0x6   :  { %1822 = sst [smem:[#allocation35_spill]] %s1798_s6 }
   0x7   :  { %12 = vsyncpa [#allocation3], 0 }
   0x8   :  { %14 = vsyncpa [#allocation3 + $0x1], 0 }
   0x9   :  { %15 = vsyncpa [#allocation6], 0 }
   0xa   :  { %17 = vsyncpa [#allocation6 + $0x1], 0 }
   0xb   :  { %18 = vsyncpa [#allocation9], 0 }
   0xc   :  { %19 = vsyncpa [#allocation4], 0 }
   0xd   :  { %21 = vsyncpa [#allocation4 + $0x1], 0 }
   0xe   :  { %22 = vsyncpa [#allocation12], 0 }
   0xf   :  { %24 = vsyncpa [#allocation12 + $0x1], 0  ;;  %s1394_s21 = smov 0   ;;  %s1396_s22 = smov 0  }
  0x10   :  { %s1398_s23 = smov 0   ;;  %s1400_s24 = smov 0  }
  0x11   :  { %s1402_s25 = smov 0   ;;  %s1404_s26 = smov 0  }
  0x12   :  { %s1406_s27 = smov 0   ;;  %s1408_s28 = smov 0  }
  0x13   :  { %s1410_s29 = smov 0   ;;  %s1412_s30 = smov 0  }
  0x14   :  { %s1414_s7 = smov 0   ;;  %s1416_s8 = smov 0  }
  0x15   :  { %s1418_s9 = smov 0   ;;  %s1420_s10 = smov 0  }
  0x16 LB: > { %1823 = sst [smem:[#allocation20_spill]] %s1288_s21  ;;  %s1463_s11 = sadd.s32 4294967295, %s1340_s10   ;;  %s1340_s10 = sphi %s1420_s10, %s30_s10   ;;  %s1336_s9 = sphi %s1418_s9, %s1873_s9   ;;  %s1332_s8 = sphi %s1416_s8, %s1883_s8   ;;  %s1328_s7 = sphi %s1414_s7, %s1871_s7   ;;  %s1324_s30 = sphi %s1412_s30, %s1882_s30   ;;  %s1320_s29 = sphi %s1410_s29, %s1870_s29   ;;  %s1316_s28 = sphi %s1408_s28, %s1881_s28   ;;  %s1312_s27 = sphi %s1406_s27, %s1880_s27   ;;  %s1308_s26 = sphi %s1404_s26, %s1879_s26   ;;  %s1304_s25 = sphi %s1402_s25, %s1878_s25   ;;  %s1300_s24 = sphi %s1400_s24, %s1877_s24   ;;  %s1296_s23 = sphi %s1398_s23, %s1876_s23   ;;  %s1292_s22 = sphi %s1396_s22, %s1875_s22   ;;  %s1288_s21 = sphi %s1394_s21, %s1874_s21  }
  0x17   : > { %1824 = sst [smem:[#allocation21_spill]] %s1320_s29  ;;  %s1799_s12 = sadd.s32 4294967294, %s1340_s10  }
  0x18   : > { %1825 = sst [smem:[#allocation22_spill]] %s1336_s9  ;;  %p1801_p0 = scmp.eq.s32.totalorder %s1463_s11, 0 }
  0x19   : > { %p97_p1 = scmp.ne.s32.totalorder %s1304_s25, %s1300_s24  ;;  %p176_p2 = scmp.ne.s32.totalorder %s1296_s23, %s1292_s22 }
  0x1a   : > { %p177_p3 = scmp.eq.s32.totalorder %s1463_s11, 3  ;;  %p182_p5 = scmp.ne.s32.totalorder %s1292_s22, %s1288_s21 }
  0x1b   : > { %p1473_p4 = por %p97_p1, %p1801_p0  ;;  %p183_p7 = scmp.eq.s32.totalorder %s1799_s12, 3 }
  0x1c   : > { %p1479_p6 = por %p177_p3, %p176_p2  ;;  %p801_p8 = scmp.ge.s32.totalorder %s1340_s10, 1 }
  0x1d   : > { %s1826_s13 = scalar_select %p1473_p4, 1, 0 }
  0x1e   : > { %s1827_s14 = scalar_select %p1479_p6, 1, 0 }
  0x1f   : > { %p250_p9 = scmp.lt.s32.totalorder %s1340_s10, 5  ;;  %p1487_p10 = por %p183_p7, %p182_p5 }
  0x20   : > { %1828 = sst [smem:[#allocation23_spill]] %s1827_s14  ;;  %s1342_s17 = smov [#allocation7]  }
  0x21   : > { %s1829_s15 = scalar_select %p1487_p10, 1, 0 }
  0x22   : > { %p1491_p11 = pnand %p801_p8, %p250_p9  ;;  %s265_s18 = sshll.u32 %s1342_s17, 4  ;;  %s266_s18 = int_to_ptr.vmem [resolvable:$true] %s265_s18 }
  0x23   : > { %1830 = sst [smem:[#allocation24_spill]] %s1829_s15  ;;  %s1343_s20 = smov [#allocation8]  }
  0x24   : > { %s1831_s16 = scalar_select %p1491_p11, 1, 0 }
  0x25   : > { %p864_p12 = pneg %p1491_p11  ;;  %s278_s24 = sshll.u32 %s1343_s20, 4  ;;  %s279_s24 = int_to_ptr.vmem [resolvable:$true] %s278_s24 }
  0x26   : > { %s1031_s12 = scalar_lea.vmem %s266_s18, 128  ;;  %p1039_p7 = scmp.lt.s32.totalorder %s266_s18, %s266_s18 }
  0x27   : > { %p1499_p13 = pnand %p864_p12, %p1801_p0  ;;  %p1032_p2 = scmp.ne.s32.totalorder %s266_s18, %s1031_s12 }
  0x28   : > { %p1040_p8 = scmp.lt.s32.totalorder %s1031_s12, %s1031_s12 }
  0x29   : > { %p1022_p1 = pneg %p1499_p13 }
  0x2a   : > { %p1041_p9 = por %p1040_p8, %p1039_p7 }
  0x2b   : > { %p1034_p3 = pnand %p1032_p2, %p1022_p1 }
  0x2d   : > { %p1035_p5 = pneg %p1034_p3 }
  0x2f   : > { %p1042_p12 = pnand %p1041_p9, %p1035_p5 }
  0x31   : > { %1045 = shalt.err (!%p1042_p12)
}
  0x32   : > { %s1833_s2 = sld [smem:[#allocation31_spill]]  ;;  %s1057_s20 = scalar_lea.vmem %s279_s24, 128 }
  0x33   : > { %p1058_p0 = scmp.ne.s32.totalorder %s279_s24, %s1057_s20  ;;  %p1065_p2 = scmp.lt.s32.totalorder %s279_s24, %s279_s24 }
  0x34   : > { %p1066_p3 = scmp.lt.s32.totalorder %s1057_s20, %s1057_s20 }
  0x35   : > { %p1060_p10 = pnand %p1058_p0, %p1022_p1 }
  0x36   : > { %p1067_p4 = por %p1066_p3, %p1065_p2 }
  0x37   : > { %p1061_p6 = pneg %p1060_p10 }
  0x38   : > { %867 = dma.hbm_to_vmem [thread:$0]  (!%p1499_p13), %s1833_s2, 128, %s266_s18, [#allocation6]  }
  0x39   : > { %p1068_p11 = pnand %p1067_p4, %p1061_p6 }
  0x3b   : > { %1071 = shalt.err (!%p1068_p11)
}
  0x3c   : > { %s1834_s3 = sld [smem:[#allocation32_spill]]  ;;  %s42_s15 = sadd.s32 1, %s1332_s8 }
  0x3d   : > { %p43_p0 = scmp.ge.s32.totalorder %s42_s15, 2  ;;  %s49_s21 = sadd.s32 1, %s1336_s9 }
  0x3e   : > { %s58_s18 = sadd.s32 1, %s1320_s29  ;;  %p65_p4 = scmp.ne.s32.totalorder %s1320_s29, %s1316_s28 }
  0x3f   : > { %s1885_s15 = smov (%p43_p0, %s42_s15), 0  ;;  %s1887_s21 = smov (!%p43_p0, %s49_s21), %s1336_s9 }
  0x40   : > { %1835 = sst [smem:[#allocation25_spill]] %s1885_s15  ;;  %p66_p6 = scmp.eq.s32.totalorder %s1340_s10, 0 }
  0x41   : > { %p71_p10 = scmp.ne.s32.totalorder %s1316_s28, %s1312_s27  ;;  %p51_p11 = scmp.ge.s32.totalorder %s1887_s21, 2 }
  0x42   : > { %870 = dma.hbm_to_vmem [thread:$0]  (!%p1499_p13), %s1834_s3, 128, %s279_s24, [#allocation9]  }
  0x43   : > { %s81_s19 = ssub.s32 %s1332_s8, %s1885_s15  ;;  %p1536_p13 = por %p66_p6, %p65_p4 }
  0x44   : > { %p1837_p1 = scmp.eq.s32.totalorder %s1463_s11, 0  ;;  %s1889_s21 = smov (%p51_p11, %s1887_s21), 0 }
  0x45   : > { %1839 = sst [smem:[#allocation26_spill]] %s1889_s21  ;;  %p82_p7 = scmp.eq.s32.totalorder %s81_s19, 0 }
  0x46   : > { %p1542_p5 = por %p1837_p1, %p71_p10  ;;  %s84_s27 = sadd.s32 1, %s1308_s26 }
  0x47   : > { %s53_s20 = ssub.s32 %s1336_s9, %s1889_s21  ;;  %p91_p8 = scmp.ne.s32.totalorder %s1308_s26, %s1304_s25 }
  0x48   : > { %p56_p9 = scmp.eq.s32.totalorder %s53_s20, 0  ;;  %s161_s12 = sor.u32 %s81_s19, %s53_s20 }
  0x49   : > { %s1554_s2 = scalar_select %p82_p7, %s1308_s26, %s84_s27  }
  0x4a   : > { %s1557_s3 = scalar_select %p56_p9, %s1320_s29, %s58_s18  }
  0x4b   : > { %1840 = sst [smem:[#allocation27_spill]] %s1554_s2  ;;  %p1561_p12 = por %p91_p8, %p66_p6 }
  0x4c   : > { %1841 = sst [smem:[#allocation28_spill]] %s1557_s3  ;;  %p164_p2 = scmp.eq.s32.totalorder %s161_s12, 0 }
  0x4d   : > { %s166_s6 = sadd.s32 1, %s1296_s23  ;;  %p890_p3 = scmp.lt.s32.totalorder %s1340_s10, 4 }
  0x4e   : > { %s1568_s5 = scalar_select %p164_p2, %s1296_s23, %s166_s6  }
  0x4f   : > { %s289_s21 = sand.u32 1, %s1320_s29   ;;  %s806_s4 = sshll.u32 %s1336_s9, 6 }
  0x50   : > { %1843 = sst [smem:[#allocation29_spill]] %s1568_s5  ;;  %s805_s14 = sshll.u32 %s289_s21, 2 }
  0x51   : > { %s1844_s0 = sld [smem:[#allocation30_spill]]  ;;  %s293_s18 = scalar_lea.vmem [#allocation2], %s805_s14 }
  0x52   : > { %s301_s3 = sshll.u32 %s293_s18, 4  ;;  %p1577_p0 = pnand %p890_p3, %p1536_p13  ;;  %s302_s3 = int_to_ptr.vmem [resolvable:$true] %s301_s3 }
  0x53   : > { %p1583_p4 = pnand %p890_p3, %p1561_p12  ;;  %s308_s12 = sand.u32 1, %s1340_s10  }
  0x54   : > { %s290_s9 = scalar_lea.sflag [#allocation3], %s289_s21  ;;  %p1074_p6 = pneg %p1577_p0 }
  0x55   : > { %s1085_s19 = scalar_lea.vmem %s302_s3, 64 }
  0x56   : > { %p1086_p10 = scmp.ne.s32.totalorder %s302_s3, %s1085_s19 }
  0x57   : > { %s299_s20 = scalar_lea.hbm %s1844_s0, %s806_s4  ;;  %s1344_s4 = smov [#allocation2]  }
  0x58   : > { %p1088_p11 = pnand %p1086_p10, %p1074_p6  ;;  %s1090_s14 = sshll.u32 %s1344_s4, 4  ;;  %s1091_s14 = int_to_ptr.vmem [resolvable:$false] %s1090_s14 }
  0x59   : > { %s1092_s24 = scalar_lea.vmem %s1091_s14, 128  ;;  %p1093_p13 = scmp.lt.s32.totalorder %s302_s3, %s1091_s14 }
  0x5a   : > { %p1089_p1 = pneg %p1088_p11  ;;  %p1094_p7 = scmp.lt.s32.totalorder %s1092_s24, %s1085_s19 }
  0x5c   : > { %p1095_p8 = por %p1094_p7, %p1093_p13 }
  0x5e   : > { %p1096_p9 = pnand %p1095_p8, %p1089_p1 }
  0x60   : > { %1099 = shalt.err (!%p1096_p9)
}
  0x61   : > { %874 = dma.hbm_to_vmem [thread:$0]  (!%p1577_p0), %s299_s20, 64, %s302_s3, %s290_s9  }
  0x62   : > { %s310_s15 = sand.u32 1, %s1308_s26   ;;  %s833_s21 = sshll.u32 %s1332_s8, 8 }
  0x63   : > { %s807_s27 = sshll.u32 %s310_s15, 4  ;;  %s318_s4 = scalar_lea.hbm %s1793_s1, %s833_s21 }
  0x64   : > { %s312_s29 = scalar_lea.vmem [#allocation5], %s807_s27  ;;  %s309_s19 = scalar_lea.sflag [#allocation6], %s308_s12 }
  0x65   : > { %s319_s5 = sshll.u32 %s312_s29, 4  ;;  %p1102_p12 = pneg %p1583_p4  ;;  %s320_s5 = int_to_ptr.vmem [resolvable:$true] %s319_s5 }
  0x66   : > { %s1113_s14 = scalar_lea.vmem %s320_s5, 256  ;;  %s1345_s2 = smov [#allocation5]  }
  0x67   : > { %p1114_p2 = scmp.ne.s32.totalorder %s320_s5, %s1113_s14  ;;  %s1118_s24 = sshll.u32 %s1345_s2, 4  ;;  %s1119_s24 = int_to_ptr.vmem [resolvable:$false] %s1118_s24 }
  0x68   : > { %s1120_s3 = scalar_lea.vmem %s1119_s24, 512  ;;  %p1121_p0 = scmp.lt.s32.totalorder %s320_s5, %s1119_s24 }
  0x69   : > { %p1116_p3 = pnand %p1114_p2, %p1102_p12  ;;  %p1122_p10 = scmp.lt.s32.totalorder %s1120_s3, %s1113_s14 }
  0x6b   : > { %p1117_p6 = pneg %p1116_p3  ;;  %p1123_p11 = por %p1122_p10, %p1121_p0 }
  0x6d   : > { %p1124_p1 = pnand %p1123_p11, %p1117_p6 }
  0x6f   : > { %1127 = shalt.err (!%p1124_p1)
}
  0x70   : > { %s1346_s0 = smov 64   ;;  %s1347_s29 = smov 4  }
  0x71   : > { %877 = dma.hbm_to_vmem [thread:$0]  (!%p1583_p4), %s318_s4, 256, %s320_s5, %s309_s19, %s1346_s0, %s1346_s0, %s1347_s29  }
  0x72   : > { %p1847_p13 = scmp.ne.s32.totalorder %s1831_s16, 0 }
  0x73   : > { %s333_s9 = sand.u32 (!%p1847_p13), 1, %s1316_s28  }
  0x74   : > { %331 = sbr.rel (%p1847_p13) target bundleno = 632 (0x278), region = 36  ;;  %s1604_s20 = sshll.u32 (!%p1847_p13), %s333_s9, 2 }
  0x75   : > { %s334_s12 = scalar_lea.sflag (!%p1847_p13), [#allocation3], %s333_s9  ;;  %s337_s15 = scalar_lea.vmem (!%p1847_p13), [#allocation2], %s1604_s20 }
  0x79   : > { %1263 = dma.done.wait (%p1542_p5), %s334_s12, 64  }
  0x7a   : > { %1265 = vsyncadd (%p1542_p5), %s334_s12, 4294967232  ;;  %s1815_s5 = sand.u32 1, %s1463_s11   ;;  %s344_s16 = sand.u32 1, %s1304_s25  }
  0x7b   : > { %s812_s6 = sshll.u32 %s344_s16, 4  ;;  %s343_s21 = scalar_lea.sflag [#allocation6], %s1815_s5 }
  0x7c   : > { %s346_s27 = scalar_lea.vmem [#allocation5], %s812_s6  ;;  %p1848_p4 = scmp.ne.s32.totalorder %s1826_s13, 0 }
  0x7e   : > { %1267 = dma.done.wait (%p1848_p4), %s343_s21, 256  }
  0x7f   : > { %1269 = vsyncadd (%p1848_p4), %s343_s21, 4294967040  ;;  %p1849_p7 = scmp.eq.s32.totalorder %s1463_s11, 0 }
  0x81   : > { %1271 = dma.done.wait (%p1849_p7), [#allocation6], 128   ;;  %p1850_p5 = pmov %p1849_p7 }
  0x83   : > { %1273 = vsyncadd (%p1850_p5), [#allocation6], 4294967168  ;;  %p1851_p8 = pmov %p1850_p5 }
  0x84   : > { %p1852_p9 = pmov %p1850_p5 }
  0x85   : > { %1275 = dma.done.wait (%p1851_p8), [#allocation9], 128  }
  0x86   : > { %1277 = vsyncadd (%p1852_p9), [#allocation9], 4294967168  ;;  %v1348_v0 = vmov 0.0   ;;  %vm1349_vm0 = vmmov 0   ;;  %v1018_v1 = vld [vmem:[%s346_s27 + $0x8] sm:$0xff]   ;;  %v1019_v2 = vld [vmem:[%s346_s27] sm:$0xff]  }
  0x87   : > { %838 = vmatprep.subr.bf16.mxu0 %v1348_v0  ;;  %842 = vmatprep.mubr.msk.bf16.mxu0 %vm1349_vm0, %v1348_v0  ;;  %v404_v3 = vld [vmem:[#allocation7] sm:$0xff]  ;;  %s1350_s13 = smov 24   ;;  %s1351_s17 = smov 8   ;;  %v405_v4 = vld [vmem:[#allocation8] sm:$0xff]  ;;  %v399_v5 = vld [vmem:[%s337_s15] sm:$0xf] }
  0x88   : > { %839 = vmatpush3.bf16.msra.mxu0 %v1018_v1  ;;  %511 = vrot.lane.b32.xlu1 %v404_v3, %s1350_s13  ;;  %vm418_vm1 = vcmask 261120   ;;  %s1352_s18 = smov 16   ;;  %s1353_s4 = smov 120   ;;  %vm488_vm2 = vcmask 64512   ;;  %vm492_vm3 = vcmask 125952  }
  0x89   : > { %840 = vmatprep.subr.bf16.mxu0 %v1348_v0  ;;  %475 = vrot.lane.b32.xlu0 %v404_v3, %s1351_s17  ;;  %s1354_s19 = smov 112   ;;  %s1355_s14 = smov 96  }
  0x8a   : > { %s381_s2 = sand.u32 1, %s1292_s22   ;;  %s825_s24 = sshll.u32 %s1328_s7, 1 }
  0x8b   : > { %s1634_s3 = sshll.u32 %s381_s2, 2  ;;  %s562_s0 = sadd.s32 %s1324_s30, %s825_s24 }
  0x8c   : > { %841 = vmatpush3.bf16.msra.mxu0 %v1019_v2  ;;  %464 = vrot.lane.b32.xlu1 %v405_v4, %s1351_s17  ;;  %s826_s29 = sshll.u32 %s562_s0, 6  ;;  %s383_s9 = scalar_lea.vmem [#allocation10], %s1634_s3 }
  0x8d   : > { %498 = vrot.lane.b32.xlu0 %v405_v4, %s1350_s13  ;;  %s566_s20 = sshll.u32 %s383_s9, 4  ;;  %s397_s7 = scalar_lea.vmem [#allocation13], %s1634_s3  ;;  %s1648_s20 = int_to_ptr.vmem [resolvable:$true] %s566_s20 }
  0x8e   : > { %s598_s12 = sshll.u32 %s397_s7, 4  ;;  %s1816_s15 = scalar_lea.vmem [#allocation11], %s1634_s3  ;;  %s1665_s12 = int_to_ptr.vmem [resolvable:$true] %s598_s12 }
  0x8f   : > { %843 = vmatmul.mubr.msk.bf16.vlgmr.msra.gmra.mxu0 %vm418_vm1, %v399_v5  ;;  %s582_s16 = sshll.u32 %s1816_s15, 4  ;;  %s1853_s6 = sld [smem:[#allocation23_spill]]  ;;  %s1657_s16 = int_to_ptr.vmem [resolvable:$true] %s582_s16 }
  0x90   : > { %507 = vrot.lane.b32.xlu1 %v405_v4, %s1352_s18  ;;  %s1854_s27 = sld [smem:[#allocation33_spill]] }
  0x91   : > { %494 = vrot.lane.b32.xlu0 %v404_v3, %s1352_s18  ;;  %s1857_s30 = sld [smem:[#allocation35_spill]]  ;;  %s1356_s18 = smov [#allocation10]  }
  0x95   : > { %p1859_p2 = scmp.ne.s32.totalorder %s1853_s6, 0 }
  0x96   : > { %s1855_s13 = smov %s1854_s27 }
  0x97   : > { %s1858_s5 = smov %s1857_s30  ;;  %s1663_s21 = scalar_lea.hbm %s1857_s30, %s826_s29 }
  0xfa   : > { %v512_v7 = vpop.permute.xlu1 %511 }
  0xfb   : > { %v476_v6 = vpop.permute.xlu0 %475 }
  0xfe   : > { %v465_v13 = vpop.permute.xlu1 %464 }
  0xff   : > { %v499_v8 = vpop.permute.xlu0 %498 }
 0x102   : > { %v508_v18 = vpop.permute.xlu1 %507 }
 0x103   : > { %v495_v19 = vpop.permute.xlu0 %494 }
 0x14f   : > { %v456_v9 = vpop.f32.mrf.mxu0 }
 0x150   : > { %v501_v10 = vmul.f32 %v499_v8, %v456_v9  ;;  %v478_v11 = vmul.f32 %v476_v6, %v456_v9  ;;  %v514_v15 = vmul.f32 %v512_v7, %v456_v9  ;;  %v467_v16 = vmul.f32 %v465_v13, %v456_v9 }
 0x151   : > { %v844_v12 = vpop.f32.mrf.mxu0  ;;  %v497_v20 = vmul.f32 %v495_v19, %v456_v9  ;;  %v473_v21 = vmul.f32 %v456_v9, %v405_v4  ;;  %v510_v26 = vmul.f32 %v508_v18, %v456_v9  ;;  %v834_v29 = vpack.c.bf16 %v456_v9, %v456_v9 }
 0x152   : > { %503 = vrot.lane.b32.xlu1 %v501_v10, %s1353_s4  ;;  %480 = vrot.lane.b32.xlu0 %v478_v11, %s1353_s4  ;;  %v462_v31 = vmul.f32 %v456_v9, %v404_v3 }
 0x153   : > { %v459_v14 = vpop.f32.mrf.mxu0 }
 0x155   : > { %v845_v17 = vpop.f32.mrf.mxu0 }
 0x156   : > { %516 = vrot.lane.b32.xlu0 %v514_v15, %s1353_s4  ;;  %469 = vrot.lane.b32.xlu1 %v467_v16, %s1353_s4 }
 0x1c4   : > { %v504_v22 = vpop.permute.xlu1 %503  ;;  %v481_v23 = vpop.permute.xlu0 %480 }
 0x1c5   : > { %v506_v24 = vsub.f32 %v497_v20, %v504_v22  ;;  %v483_v25 = vadd.f32 %v481_v23, %v473_v21 }
 0x1c7   : > { %485 = vrot.lane.b32.xlu0 %v483_v25, %s1351_s17  ;;  %521 = vrot.lane.b32.xlu1 %v506_v24, %s1354_s19  ;;  %s1646_s17 = scalar_lea.hbm %s1854_s27, %s826_s29  ;;  %s1856_s19 = sld [smem:[#allocation34_spill]] }
 0x1c8   : > { %v517_v27 = vpop.permute.xlu0 %516  ;;  %v470_v30 = vpop.permute.xlu1 %469  ;;  %s1128_s27 = scalar_lea.vmem %s1648_s20, 64 }
 0x1c9   : > { %v519_v28 = vadd.f32 %v517_v27, %v510_v26  ;;  %v472_v32 = vsub.f32 %v462_v31, %v470_v30  ;;  %p1129_p12 = scmp.ne.s32.totalorder %s1648_s20, %s1128_s27 }
 0x1cb   : > { %525 = vrot.lane.b32.xlu0 %v519_v28, %s1353_s4  ;;  %535 = vrot.lane.b32.xlu1 %v834_v29, %s1355_s14  ;;  %p1130_p3 = pnand %p1129_p12, %p1859_p2  ;;  %s1132_s4 = sshll.u32 %s1356_s18, 4  ;;  %s1133_s4 = int_to_ptr.vmem [resolvable:$false] %s1132_s4 }
 0x1cc   : > { %s1134_s15 = scalar_lea.vmem %s1133_s4, 128  ;;  %p1135_p0 = scmp.lt.s32.totalorder %s1648_s20, %s1133_s4 }
 0x1cd   : > { %s1655_s14 = scalar_lea.hbm %s1856_s19, %s826_s29  ;;  %p1131_p6 = pneg %p1130_p3 }
 0x1ce   : > { %p1136_p10 = scmp.lt.s32.totalorder %s1134_s15, %s1128_s27 }
 0x1d0   : > { %p1137_p11 = por %p1136_p10, %p1135_p0 }
 0x1d2   : > { %p1138_p1 = pnand %p1137_p11, %p1131_p6 }
 0x239   : > { %v486_v33 = vpop.permute.xlu0 %485  ;;  %v522_v34 = vpop.permute.xlu1 %521 }
 0x23a   : > { %v489_v35 = vsel %vm488_vm2, %v472_v32, %v486_v33 }
 0x23b   : > { %v490_v36 = vmul.f32 0.36067376, %v489_v35 }
 0x23d   : > { %v491_v37 = vpack.c.bf16 %v490_v36, %v490_v36  ;;  %v526_v38 = vpop.permute.xlu0 %525  ;;  %v536_v39 = vpop.permute.xlu1 %535 }
 0x23e   : > { %v528_v40 = vsel %vm488_vm2, %v522_v34, %v526_v38  ;;  %538 = vst.msk [vmem:[%s397_s7] sm:$0xf] %vm492_vm3, %v536_v39  ;;  %s540_s7 = scalar_lea.sflag [#allocation4], %s381_s2 }
 0x23f   : > { %v529_v41 = vpack.c.bf16 %v528_v40, %v528_v40  ;;  %493 = vst.msk [vmem:[%s383_s9] sm:$0xf] %vm492_vm3, %v491_v37 }
 0x240   : > { %1141 = shalt.err (!%p1138_p1)
}
 0x241   : > { %s1142_s29 = scalar_lea.hbm %s1646_s17, 64  ;;  %s1146_s24 = scalar_lea.hbm %s1855_s13, 256 }
 0x242   : > { %p1143_p13 = scmp.ne.s32.totalorder %s1646_s17, %s1142_s29  ;;  %p1147_p5 = scmp.lt.s32.totalorder %s1646_s17, %s1855_s13 }
 0x243   : > { %p1148_p8 = scmp.lt.s32.totalorder %s1146_s24, %s1142_s29 }
 0x244   : > { %p1144_p4 = pnand %p1143_p13, %p1859_p2 }
 0x245   : > { %p1149_p9 = por %p1148_p8, %p1147_p5 }
 0x246   : > { %p1145_p7 = pneg %p1144_p4 }
 0x248   : > { %p1150_p12 = pnand %p1149_p9, %p1145_p7 }
 0x24a   : > { %1153 = shalt.err (!%p1150_p12)
}
 0x24b   : > { %858 = dma.vmem_to_hbm [thread:$0]  (%p1859_p2), %s1648_s20, 64, %s1646_s17, %s540_s7  }
 0x24c   : > { %s1860_s15 = scalar_lea.vmem [#allocation11], %s1634_s3  ;;  %s1861_s27 = sand.u32 1, %s1463_s11  }
 0x24d   : > { %530 = vst.msk [vmem:[%s1860_s15] sm:$0xf] %vm492_vm3, %v529_v41  ;;  %s1694_s18 = scalar_lea.sflag [#allocation12], %s1861_s27  ;;  %s1154_s4 = scalar_lea.vmem %s1657_s16, 64 }
 0x24e   : > { %p1155_p3 = scmp.ne.s32.totalorder %s1657_s16, %s1154_s4  ;;  %s1357_s29 = smov [#allocation11]  }
 0x24f   : > { %s1158_s2 = sshll.u32 %s1357_s29, 4  ;;  %s1159_s2 = int_to_ptr.vmem [resolvable:$false] %s1158_s2 }
 0x250   : > { %p1156_p6 = pnand %p1155_p3, %p1859_p2  ;;  %s1160_s9 = scalar_lea.vmem %s1159_s2, 128 }
 0x251   : > { %p1161_p10 = scmp.lt.s32.totalorder %s1657_s16, %s1159_s2  ;;  %p1162_p11 = scmp.lt.s32.totalorder %s1160_s9, %s1154_s4 }
 0x252   : > { %p1157_p0 = pneg %p1156_p6 }
 0x253   : > { %p1163_p1 = por %p1162_p11, %p1161_p10 }
 0x255   : > { %p1164_p13 = pnand %p1163_p1, %p1157_p0 }
 0x257   : > { %1167 = shalt.err (!%p1164_p13)
}
 0x258   : > { %s1168_s11 = scalar_lea.hbm %s1655_s14, 64  ;;  %s1172_s17 = scalar_lea.hbm %s1856_s19, 256 }
 0x259   : > { %p1169_p4 = scmp.ne.s32.totalorder %s1655_s14, %s1168_s11  ;;  %p1173_p8 = scmp.lt.s32.totalorder %s1655_s14, %s1856_s19 }
 0x25a   : > { %p1174_p9 = scmp.lt.s32.totalorder %s1172_s17, %s1168_s11 }
 0x25b   : > { %p1170_p7 = pnand %p1169_p4, %p1859_p2 }
 0x25c   : > { %p1175_p12 = por %p1174_p9, %p1173_p8 }
 0x25d   : > { %p1171_p5 = pneg %p1170_p7 }
 0x25f   : > { %p1176_p3 = pnand %p1175_p12, %p1171_p5 }
 0x261   : > { %1179 = shalt.err (!%p1176_p3)
}
 0x262   : > { %859 = dma.vmem_to_hbm [thread:$0]  (%p1859_p2), %s1657_s16, 64, %s1655_s14, %s1694_s18  }
 0x263   : > { %s1180_s0 = scalar_lea.vmem %s1665_s12, 64  ;;  %s1358_s30 = smov [#allocation13]  }
 0x264   : > { %p1181_p6 = scmp.ne.s32.totalorder %s1665_s12, %s1180_s0  ;;  %s1184_s15 = sshll.u32 %s1358_s30, 4  ;;  %s1185_s15 = int_to_ptr.vmem [resolvable:$false] %s1184_s15 }
 0x265   : > { %s1186_s27 = scalar_lea.vmem %s1185_s15, 128  ;;  %p1187_p11 = scmp.lt.s32.totalorder %s1665_s12, %s1185_s15 }
 0x266   : > { %p1182_p0 = pnand %p1181_p6, %p1859_p2  ;;  %p1188_p1 = scmp.lt.s32.totalorder %s1186_s27, %s1180_s0 }
 0x268   : > { %p1183_p10 = pneg %p1182_p0  ;;  %p1189_p13 = por %p1188_p1, %p1187_p11 }
 0x26a   : > { %p1190_p4 = pnand %p1189_p13, %p1183_p10 }
 0x26c   : > { %1193 = shalt.err (!%p1190_p4)
}
 0x26d   : > { %s1194_s4 = scalar_lea.hbm %s1663_s21, 64  ;;  %s1198_s29 = scalar_lea.hbm %s1858_s5, 256 }
 0x26e   : > { %p1195_p7 = scmp.ne.s32.totalorder %s1663_s21, %s1194_s4  ;;  %p1199_p9 = scmp.lt.s32.totalorder %s1663_s21, %s1858_s5 }
 0x26f   : > { %p1200_p12 = scmp.lt.s32.totalorder %s1198_s29, %s1194_s4 }
 0x270   : > { %p1196_p5 = pnand %p1195_p7, %p1859_p2 }
 0x271   : > { %p1201_p3 = por %p1200_p12, %p1199_p9 }
 0x272   : > { %p1197_p8 = pneg %p1196_p5 }
 0x274   : > { %p1202_p6 = pnand %p1201_p3, %p1197_p8 }
 0x276   : > { %1205 = shalt.err (!%p1202_p6)
}
 0x277   : > { %860 = dma.vmem_to_hbm [thread:$0]  (%p1859_p2), %s1665_s12, 64, %s1663_s21, %s1694_s18  }
 0x278 PF: > { %s1862_s11 = sld [smem:[#allocation20_spill]]  ;;  %p893_p0 = scmp.ge.s32.totalorder %s1340_s10, 2 }
 0x279   : > { %s1863_s3 = sld [smem:[#allocation24_spill]] }
 0x27e   : > { %s610_s20 = sand.u32 1, %s1862_s11  }
 0x27f   : > { %p1864_p10 = scmp.ne.s32.totalorder %s1863_s3, 0  ;;  %s611_s17 = scalar_lea.sflag [#allocation4], %s610_s20 }
 0x281   : > { %p879_p11 = pnand %p893_p0, %p1864_p10 }
 0x283   : > { %p880_p1 = pneg %p879_p11 }
 0x285   : > { %1279 = dma.done.wait (%p880_p1), %s611_s17, 64  }
 0x286   : > { %1281 = vsyncadd (%p880_p1), %s611_s17, 4294967232  ;;  %s1865_s7 = sadd.s32 4294967294, %s1340_s10  }
 0x287   : > { %s619_s24 = sand.u32 1, %s1865_s7  }
 0x288   : > { %s620_s6 = scalar_lea.sflag [#allocation12], %s619_s24 }
 0x289   : > { %1283 = dma.done.wait (%p880_p1), %s620_s6, 128  }
 0x28a   : > { %1285 = vsyncadd (%p880_p1), %s620_s6, 4294967168  ;;  %s30_s10 = sadd.s32 1, %s1340_s10   ;;  %s1867_s18 = sld [smem:[#allocation29_spill]] }
 0x28b   : > { %p1745_p2 = scmp.ge.s32.totalorder %s30_s10, 6   ;;  %s1868_s0 = sld [smem:[#allocation27_spill]] }
 0x28c   : > { %s1869_s30 = sld [smem:[#allocation21_spill]]  ;;  %s1874_s21 = smov %s1292_s22 }
 0x28d   : > { %s1870_s29 = sld [smem:[#allocation28_spill]]  ;;  %s1875_s22 = smov %s1296_s23 }
 0x28e   : > { %s1871_s7 = sld [smem:[#allocation22_spill]]  ;;  %s1877_s24 = smov %s1304_s25 }
 0x28f   : > { %s1872_s15 = sld [smem:[#allocation25_spill]]  ;;  %s1878_s25 = smov %s1308_s26 }
 0x290   : > { %s1873_s9 = sld [smem:[#allocation26_spill]]  ;;  %s1876_s23 = smov %s1867_s18 }
 0x291   : > { %s1879_s26 = smov %s1868_s0  ;;  %s1880_s27 = smov %s1316_s28 }
 0x292   : > { %s1881_s28 = smov %s1869_s30  ;;  %s1882_s30 = smov %s1332_s8 }
 0x293   :  { %29 = sbr.rel (!%p1745_p2) target bundleno = 22 (0x16), region = 136 }
 0x295   : > { %s1883_s8 = smov %s1872_s15 }
 0x298   :  { %634 = vsyncpa [#allocation3], 1 }
 0x299   :  { %636 = vsyncpa [#allocation3 + $0x1], 1 }
 0x29a   :  { %637 = vsyncpa [#allocation6], 1 }
 0x29b   :  { %639 = vsyncpa [#allocation6 + $0x1], 1 }
 0x29c   :  { %640 = vsyncpa [#allocation9], 1 }
 0x29d   :  { %641 = vsyncpa [#allocation4], 1 }
 0x29e   :  { %643 = vsyncpa [#allocation4 + $0x1], 1 }
 0x29f   :  { %644 = vsyncpa [#allocation12], 1 }
 0x2a0   :  { %646 = vsyncpa [#allocation12 + $0x1], 1 }

</bundles_post_ra>
